<compile_context>
chip_gen: v6e
topology: v6e:2x2x1
jax: 0.10.0
libtpu: 0.0.40
codegen_flags: <defaults>
</compile_context>

<pallas_src>
import jax
import jax.numpy as jnp
from jax.experimental import pallas as pl
from jax.experimental.pallas import tpu as pltpu


def self_att_kernel(x_ref, kt_ref, kb_ref, wv_ref, bv_ref, gamma_ref,
                    out_ref, att_ref, v_s):
    # x_ref  : (1, C, N)   input in channel-major layout (resident per batch)
    # kt_ref : (1, N, C)   folded key-side activation  kt[k, :] = M @ x_k
    # kb_ref : (1, N, 1)   k-varying bias column       kb[k]    = (Wk^T bq)·x_k
    # wv_ref : (C, C)      value 1x1-conv weight
    # bv_ref : (C, 1)      value bias (broadcast over spatial lanes)
    # gamma  : (1, 1)      scalar in SMEM
    # out_ref: (1, C, TQ)  output q-tile (channel-major)
    # att_ref: (1, N, TQ)  attention q-tile, already in 'b k q' layout
    # v_s    : (C, N)      VMEM scratch: value projection, cached per batch
    qi = pl.program_id(1)
    tq = out_ref.shape[2]

    # Per-batch init: value 1x1 conv V = Wv @ x + bv, reused by every q-tile.
    @pl.when(qi == 0)
    def _():
        v_s[...] = (jnp.dot(wv_ref[...], x_ref[0],
                            preferred_element_type=jnp.float32)
                    + bv_ref[...])

    # Query-tile columns of x (also the residual for this tile).
    q0 = pl.multiple_of(qi * tq, tq)
    xq = x_ref[0, :, pl.ds(q0, tq)]                                   # (C, TQ)

    # Transposed scores St[k, q] = key_k · query_q  (folded projection).
    st = jnp.dot(kt_ref[0], xq, preferred_element_type=jnp.float32)   # (N, TQ)
    st = st + kb_ref[0]                       # rank-1 k-side bias, bcast over q

    # Softmax over k (axis 0).  The q-constant bias terms of the original
    # module are constant along this axis and cancel exactly, so they were
    # dropped in the wrapper.
    st = st - jnp.max(st, axis=0, keepdims=True)
    e = jnp.exp(st)
    denom = jnp.sum(e, axis=0, keepdims=True)                         # (1, TQ)
    att_t = e * pl.reciprocal(denom, approx=True)                     # (N, TQ)

    att_ref[0] = att_t                        # already the module's 'b k q'

    # out = gamma * (V @ A^T) + x   (all in channel-major (C, TQ) layout)
    o = jnp.dot(v_s[...], att_t, preferred_element_type=jnp.float32)  # (C, TQ)
    out_ref[0] = gamma_ref[0, 0] * o + xq


def self_att(x_nchw, wq, bq, wk, bk, wv, bv, gamma, *, tq=128):
    """SAGAN Self_Att forward.  wq/wk: (C//8, C), wv: (C, C) (1x1 conv weights
    squeezed); returns (out NCHW, att in 'b k q' layout)."""
    B, C, W, H = x_nchw.shape
    N = W * H
    f32 = jnp.float32

    # Query-tile size: multiple of 128 when possible, must divide N.
    tq = min(tq, N)
    if N % tq != 0:
        tq = N                                   # fallback: single q-tile

    x_cn = x_nchw.reshape(B, C, N).astype(f32)   # 'b c (w h)' — free reshape

    # Fold the two C -> C//8 projections into one C x C matrix (+ rank-1 bias).
    wqf, wkf = wq.astype(f32), wk.astype(f32)
    M = wqf.T @ wkf                                        # (C, C) = Wq^T Wk
    u = wkf.T @ bq.astype(f32)                             # (C,)   = Wk^T bq
    # k-major key-side activation: kt[b, k, d] = sum_c M[d, c] x[b, c, k]
    kt = jnp.einsum('dc,bck->bkd', M, x_cn)                # (B, N, C)
    kb = jnp.einsum('c,bck->bk', u, x_cn)[..., None]       # (B, N, 1)

    wv_f = wv.astype(f32)                                  # (C, C)
    bv_c = bv.astype(f32).reshape(C, 1)                    # (C, 1)
    gamma2 = gamma.astype(f32).reshape(1, 1)               # SMEM scalar

    # Explicit scoped-VMEM budget from the chosen tiles (double-buffered
    # blocks + scratch + softmax temporaries), clamped to 64 MiB (v7x).
    fb = 4
    blocks = (C * N + N * C + N * 128 + C * tq + N * tq) * fb
    scratch_b = C * N * fb
    interm = 6 * N * tq * fb
    vmem_limit = int(min(max(2 * blocks + scratch_b + interm + (4 << 20),
                             16 << 20), 64 << 20))

    grid = (B, N // tq)

    out_cn, att = pl.pallas_call(
        self_att_kernel,
        out_shape=(jax.ShapeDtypeStruct((B, C, N), f32),
                   jax.ShapeDtypeStruct((B, N, N), f32)),
        grid_spec=pltpu.PrefetchScalarGridSpec(
            num_scalar_prefetch=0,
            grid=grid,
            in_specs=[
                pl.BlockSpec((1, C, N), lambda b, q: (b, 0, 0)),    # x
                pl.BlockSpec((1, N, C), lambda b, q: (b, 0, 0)),    # kt
                pl.BlockSpec((1, N, 1), lambda b, q: (b, 0, 0)),    # kb
                pl.BlockSpec((C, C), lambda b, q: (0, 0)),          # Wv
                pl.BlockSpec((C, 1), lambda b, q: (0, 0)),          # bv
                pl.BlockSpec(memory_space=pltpu.MemorySpace.SMEM),  # gamma
            ],
            out_specs=[
                pl.BlockSpec((1, C, tq), lambda b, q: (b, 0, q)),   # out (B,C,N)
                pl.BlockSpec((1, N, tq), lambda b, q: (b, 0, q)),   # att 'b k q'
            ],
            scratch_shapes=[pltpu.VMEM((C, N), f32)],
        ),
        compiler_params=pltpu.CompilerParams(
            dimension_semantics=("parallel", "arbitrary"),
            vmem_limit_bytes=vmem_limit),
    )(x_cn, kt, kb, wv_f, bv_c, gamma2)

    out = out_cn.reshape(B, C, W, H)             # free reshape, no transpose
    return out, att


if __name__ == "__main__":
    key = jax.random.PRNGKey(0)
    B, C, W, H = 2, 16, 16, 16          # N = 256 -> two q-tiles of 128
    C8 = C // 8
    ks = jax.random.split(key, 8)

    x = jax.random.normal(ks[0], (B, C, W, H), jnp.float32)
    # Conv2d(in, out, 1) weights are (out, in, 1, 1); stored squeezed (out, in).
    wq = 0.1 * jax.random.normal(ks[1], (C8, C), jnp.float32)
    bq = 0.1 * jax.random.normal(ks[2], (C8,), jnp.float32)
    wk = 0.1 * jax.random.normal(ks[3], (C8, C), jnp.float32)
    bk = 0.1 * jax.random.normal(ks[4], (C8,), jnp.float32)
    wv = 0.1 * jax.random.normal(ks[5], (C, C), jnp.float32)
    bv = 0.1 * jax.random.normal(ks[6], (C,), jnp.float32)
    # Module initializes gamma = zeros(1); use a nonzero value so the residual
    # path is actually exercised.
    gamma = jnp.array([0.5], jnp.float32)

    out, att = jax.block_until_ready(self_att(x, wq, bq, wk, bk, wv, bv, gamma))

    # Pure-JAX reference (mirrors the PyTorch forward exactly).
    N = W * H
    x_flat = x.reshape(B, C, N)
    q_ref = jnp.einsum('oc,bcn->bno', wq, x_flat) + bq[None, None, :]
    k_ref = jnp.einsum('oc,bcn->bon', wk, x_flat) + bk[None, :, None]
    s_ref = jnp.einsum('bqc,bck->bqk', q_ref, k_ref)
    a_ref = jax.nn.softmax(s_ref, axis=-1)
    att_ref = jnp.transpose(a_ref, (0, 2, 1))          # 'b k q'
    v_ref = jnp.einsum('oc,bcn->bon', wv, x_flat) + bv[None, :, None]
    o_ref = jnp.einsum('bck,bkq->bcq', v_ref, att_ref).reshape(B, C, W, H)
    out_ref = gamma[0] * o_ref + x

    # Tolerances account for the approximate EUP reciprocal in the softmax
    # normalization and the algebraic refactoring of the q/k projections;
    # real layout/indexing bugs produce errors orders of magnitude larger.
    assert jnp.allclose(att, att_ref, atol=2e-3), "attention mismatch"
    assert jnp.allclose(out, out_ref, atol=5e-3), "output mismatch"
    print("KERNEL_OK")
</pallas_src>

<mosaic_0001>
module attributes {stable_mosaic.version = 11 : i64} {
  func.func @self_att_kernel(%arg0: i32, %arg1: i32, %arg2: memref<1x16x256xf32, #tpu.memory_space<vmem>>, %arg3: memref<1x256x16xf32, #tpu.memory_space<vmem>>, %arg4: memref<1x256x1xf32, #tpu.memory_space<vmem>>, %arg5: memref<16x16xf32, #tpu.memory_space<vmem>>, %arg6: memref<16x1xf32, #tpu.memory_space<vmem>>, %arg7: memref<1x1xf32, #tpu.memory_space<smem>>, %arg8: memref<1x16x128xf32, #tpu.memory_space<vmem>>, %arg9: memref<1x256x128xf32, #tpu.memory_space<vmem>>, %arg10: memref<16x256xf32, #tpu.memory_space<vmem>>) attributes {dimension_semantics = [#tpu.dimension_semantics<parallel>, #tpu.dimension_semantics<arbitrary>], iteration_bounds = array<i64: 2, 2>, scalar_prefetch = 0 : i64, scratch_operands = 1 : i64, tpu.core_type = #tpu.core_type<tc>, window_params = [{transform_indices = @transform_0, window_bounds = array<i64: 1, 16, 256>}, {transform_indices = @transform_1, window_bounds = array<i64: 1, 256, 16>}, {transform_indices = @transform_2, window_bounds = array<i64: 1, 256, 1>}, {pipeline_mode = #tpu.pipeline_mode<synchronous>, transform_indices = @transform_3, window_bounds = array<i64: 16, 16>}, {pipeline_mode = #tpu.pipeline_mode<synchronous>, transform_indices = @transform_4, window_bounds = array<i64: 16, 1>}, {transform_indices = @transform_5, window_bounds = array<i64: 1, 1>}, {transform_indices = @transform_6, window_bounds = array<i64: 1, 16, 128>}, {transform_indices = @transform_7, window_bounds = array<i64: 1, 256, 128>}]} {
    %c0_i32 = arith.constant 0 : i32
    %0 = arith.cmpi eq, %arg1, %c0_i32 : i32
    %1 = arith.extui %0 : i1 to i32
    %c0_i32_0 = arith.constant 0 : i32
    %2 = arith.cmpi ne, %1, %c0_i32_0 : i32
    scf.if %2 {
      %c0_21 = arith.constant 0 : index
      %c0_22 = arith.constant 0 : index
      %37 = vector.load %arg5[%c0_21, %c0_22] : memref<16x16xf32, #tpu.memory_space<vmem>>, vector<16x16xf32>
      %c0_23 = arith.constant 0 : index
      %c0_24 = arith.constant 0 : index
      %c0_25 = arith.constant 0 : index
      %38 = vector.load %arg2[%c0_23, %c0_24, %c0_25] : memref<1x16x256xf32, #tpu.memory_space<vmem>>, vector<1x16x256xf32>
      %39 = vector.shape_cast %38 : vector<1x16x256xf32> to vector<16x256xf32>
      %cst_26 = arith.constant dense<0.000000e+00> : vector<16x256xf32>
      %40 = tpu.matmul %37, %39, %cst_26 {dimension_numbers = #tpu.dot_dimension_numbers<[1], [0], [0], [1], [0, 0, 1, 1], [], []>} : vector<16x16xf32>, vector<16x256xf32>, vector<16x256xf32> -> vector<16x256xf32>
      %c0_27 = arith.constant 0 : index
      %c0_28 = arith.constant 0 : index
      %41 = vector.load %arg6[%c0_27, %c0_28] : memref<16x1xf32, #tpu.memory_space<vmem>>, vector<16x1xf32>
      %42 = vector.broadcast %41 : vector<16x1xf32> to vector<16x256xf32>
      %43 = arith.addf %40, %42 : vector<16x256xf32>
      %c0_29 = arith.constant 0 : index
      %c0_30 = arith.constant 0 : index
      %44 = vector.load %arg10[%c0_29, %c0_30] : memref<16x256xf32, #tpu.memory_space<vmem>>, vector<16x256xf32>
      tpu.vector_store %arg10[%c0_29, %c0_30], %43 {strides = array<i32>} : memref<16x256xf32, #tpu.memory_space<vmem>>, vector<16x256xf32>,
    } else {
    }
    %c128_i32 = arith.constant 128 : i32
    %3 = arith.muli %arg1, %c128_i32 : i32
    %4 = tpu.assume_multiple %3, 128 : i32
    %c0 = arith.constant 0 : index
    %c0_1 = arith.constant 0 : index
    %5 = arith.index_cast %4 : i32 to index
    %6 = vector.load %arg2[%c0, %c0_1, %5] : memref<1x16x256xf32, #tpu.memory_space<vmem>>, vector<1x16x128xf32>
    %7 = vector.shape_cast %6 : vector<1x16x128xf32> to vector<16x128xf32>
    %c0_2 = arith.constant 0 : index
    %c0_3 = arith.constant 0 : index
    %c0_4 = arith.constant 0 : index
    %8 = vector.load %arg3[%c0_2, %c0_3, %c0_4] : memref<1x256x16xf32, #tpu.memory_space<vmem>>, vector<1x256x16xf32>
    %9 = vector.shape_cast %8 : vector<1x256x16xf32> to vector<256x16xf32>
    %cst = arith.constant dense<0.000000e+00> : vector<256x128xf32>
    %10 = tpu.matmul %9, %7, %cst {dimension_numbers = #tpu.dot_dimension_numbers<[1], [0], [0], [1], [0, 0, 1, 1], [], []>} : vector<256x16xf32>, vector<16x128xf32>, vector<256x128xf32> -> vector<256x128xf32>
    %c0_5 = arith.constant 0 : index
    %c0_6 = arith.constant 0 : index
    %c0_7 = arith.constant 0 : index
    %11 = vector.load %arg4[%c0_5, %c0_6, %c0_7] : memref<1x256x1xf32, #tpu.memory_space<vmem>>, vector<1x256x1xf32>
    %12 = vector.shape_cast %11 : vector<1x256x1xf32> to vector<256x1xf32>
    %13 = vector.broadcast %12 : vector<256x1xf32> to vector<256x128xf32>
    %14 = arith.addf %10, %13 : vector<256x128xf32>
    %cst_8 = arith.constant dense<0xFF800000> : vector<128xf32>
    %15 = vector.multi_reduction <maximumf>, %14, %cst_8 [0] : vector<256x128xf32> to vector<128xf32>
    %16 = vector.shape_cast %15 : vector<128xf32> to vector<1x128xf32>
    %17 = vector.broadcast %16 : vector<1x128xf32> to vector<256x128xf32>
    %18 = arith.subf %14, %17 : vector<256x128xf32>
    %19 = math.exp %18 : vector<256x128xf32>
    %cst_9 = arith.constant dense<0.000000e+00> : vector<128xf32>
    %20 = vector.multi_reduction <add>, %19, %cst_9 [0] : vector<256x128xf32> to vector<128xf32>
    %21 = vector.shape_cast %20 : vector<128xf32> to vector<1x128xf32>
    %22 = tpu.reciprocal %21 {approx = true} : vector<1x128xf32> -> vector<1x128xf32>
    %23 = vector.broadcast %22 : vector<1x128xf32> to vector<256x128xf32>
    %24 = arith.mulf %19, %23 : vector<256x128xf32>
    %c0_10 = arith.constant 0 : index
    %c0_11 = arith.constant 0 : index
    %c0_12 = arith.constant 0 : index
    %25 = vector.load %arg9[%c0_10, %c0_11, %c0_12] : memref<1x256x128xf32, #tpu.memory_space<vmem>>, vector<1x256x128xf32>
    %26 = vector.shape_cast %25 : vector<1x256x128xf32> to vector<256x128xf32>
    %27 = vector.shape_cast %24 : vector<256x128xf32> to vector<1x256x128xf32>
    tpu.vector_store %arg9[%c0_10, %c0_11, %c0_12], %27 {strides = array<i32>} : memref<1x256x128xf32, #tpu.memory_space<vmem>>, vector<1x256x128xf32>,
    %c0_13 = arith.constant 0 : index
    %c0_14 = arith.constant 0 : index
    %28 = vector.load %arg10[%c0_13, %c0_14] : memref<16x256xf32, #tpu.memory_space<vmem>>, vector<16x256xf32>
    %cst_15 = arith.constant dense<0.000000e+00> : vector<16x128xf32>
    %29 = tpu.matmul %28, %24, %cst_15 {dimension_numbers = #tpu.dot_dimension_numbers<[1], [0], [0], [1], [0, 0, 1, 1], [], []>} : vector<16x256xf32>, vector<256x128xf32>, vector<16x128xf32> -> vector<16x128xf32>
    %c0_16 = arith.constant 0 : index
    %c0_17 = arith.constant 0 : index
    %30 = memref.load %arg7[%c0_16, %c0_17] : memref<1x1xf32, #tpu.memory_space<smem>>
    %31 = vector.broadcast %30 : f32 to vector<16x128xf32>
    %32 = arith.mulf %31, %29 : vector<16x128xf32>
    %33 = arith.addf %32, %7 : vector<16x128xf32>
    %c0_18 = arith.constant 0 : index
    %c0_19 = arith.constant 0 : index
    %c0_20 = arith.constant 0 : index
    %34 = vector.load %arg8[%c0_18, %c0_19, %c0_20] : memref<1x16x128xf32, #tpu.memory_space<vmem>>, vector<1x16x128xf32>
    %35 = vector.shape_cast %34 : vector<1x16x128xf32> to vector<16x128xf32>
    %36 = vector.shape_cast %33 : vector<16x128xf32> to vector<1x16x128xf32>
    tpu.vector_store %arg8[%c0_18, %c0_19, %c0_20], %36 {strides = array<i32>} : memref<1x16x128xf32, #tpu.memory_space<vmem>>, vector<1x16x128xf32>,
    return
  }
  func.func @transform_0(%arg0: i32, %arg1: i32) -> (i32, i32, i32) {
    %c0_i32 = arith.constant 0 : i32
    %c0_i32_0 = arith.constant 0 : i32
    %c0_i32_1 = arith.constant 0 : i32
    return %arg0, %c0_i32, %c0_i32_0 : i32, i32, i32
  }
  func.func @transform_1(%arg0: i32, %arg1: i32) -> (i32, i32, i32) {
    %c0_i32 = arith.constant 0 : i32
    %c0_i32_0 = arith.constant 0 : i32
    %c0_i32_1 = arith.constant 0 : i32
    return %arg0, %c0_i32, %c0_i32_0 : i32, i32, i32
  }
  func.func @transform_2(%arg0: i32, %arg1: i32) -> (i32, i32, i32) {
    %c0_i32 = arith.constant 0 : i32
    %c0_i32_0 = arith.constant 0 : i32
    %c0_i32_1 = arith.constant 0 : i32
    return %arg0, %c0_i32, %c0_i32_0 : i32, i32, i32
  }
  func.func @transform_3(%arg0: i32, %arg1: i32) -> (i32, i32) {
    %c0_i32 = arith.constant 0 : i32
    %c0_i32_0 = arith.constant 0 : i32
    %c0_i32_1 = arith.constant 0 : i32
    return %c0_i32, %c0_i32_0 : i32, i32
  }
  func.func @transform_4(%arg0: i32, %arg1: i32) -> (i32, i32) {
    %c0_i32 = arith.constant 0 : i32
    %c0_i32_0 = arith.constant 0 : i32
    %c0_i32_1 = arith.constant 0 : i32
    return %c0_i32, %c0_i32_0 : i32, i32
  }
  func.func @transform_5(%arg0: i32, %arg1: i32) -> (i32, i32) {
    %c0_i32 = arith.constant 0 : i32
    %c0_i32_0 = arith.constant 0 : i32
    %c0_i32_1 = arith.constant 0 : i32
    return %c0_i32, %c0_i32_0 : i32, i32
  }
  func.func @transform_6(%arg0: i32, %arg1: i32) -> (i32, i32, i32) {
    %c0_i32 = arith.constant 0 : i32
    %c0_i32_0 = arith.constant 0 : i32
    return %arg0, %c0_i32, %arg1 : i32, i32, i32
  }
  func.func @transform_7(%arg0: i32, %arg1: i32) -> (i32, i32, i32) {
    %c0_i32 = arith.constant 0 : i32
    %c0_i32_0 = arith.constant 0 : i32
    return %arg0, %c0_i32, %arg1 : i32, i32, i32
  }
}

</mosaic_0001>

<bundles_post_ra>
// kernel: tpu_custom_call.1
= control target key start
LH: loop header
LB: loop body
LE: loop exit
PB: predicated region body
PF: predicated region fallthrough
CT: control target
= control target key end

     0   :  { %s2626_s0 = inlined_call_operand.vmem [shape: f32[2,16,256], index: 0, kind: input, shape index: {}]   ;;  %s2627_s1 = inlined_call_operand.vmem [shape: f32[2,256,16], index: 1, kind: input, shape index: {}]   ;;  %s2628_s2 = inlined_call_operand.vmem [shape: f32[2,256,1], index: 2, kind: input, shape index: {}]   ;;  %s2629_s3 = inlined_call_operand.vmem [shape: f32[16,16], index: 3, kind: input, shape index: {}]   ;;  %s2630_s4 = inlined_call_operand.vmem [shape: f32[16,1], index: 4, kind: input, shape index: {}]   ;;  %s2631_s5 = inlined_call_operand.<no memory space> [shape: f32[1,1], index: 5, kind: input, shape index: {}]   ;;  %s2632_s6 = inlined_call_operand.hbm [shape: f32[2,16,256], index: 6, kind: output, shape index: {0}]   ;;  %s2633_s7 = inlined_call_operand.hbm [shape: f32[2,256,256], index: 7, kind: output, shape index: {1}]  }
   0x1   :  { %13 = sst [smem:[#allocation3]] %s2631_s5 }
   0x2   :  { %14 = vsyncpa [#allocation5], 0 }
   0x3   :  { %16 = vsyncpa [#allocation5 + $0x1], 0 }
   0x4   :  { %17 = vsyncpa [#allocation7], 0 }
   0x5   :  { %19 = vsyncpa [#allocation7 + $0x1], 0  ;;  %s2019_s26 = smov 0   ;;  %s2021_s27 = smov 0  }
   0x6   :  { %s2023_s28 = smov 0   ;;  %s2025_s29 = smov 0  }
   0x7   :  { %s2027_s30 = smov 0   ;;  %s2029_s8 = smov 0  }
   0x8   :  { %s2031_s9 = smov 0   ;;  %s2033_s10 = smov 0  }
   0x9 LB: > { %2639 = sst [smem:[#allocation10_spill]] %s1946_s28  ;;  %s1502_s5 = sadd.s32 4294967295, %s1966_s10   ;;  %s1966_s10 = sphi %s2033_s10, %s25_s10   ;;  %s1962_s9 = sphi %s2031_s9, %s2652_s9   ;;  %s1958_s8 = sphi %s2029_s8, %s2651_s8   ;;  %s1954_s30 = sphi %s2027_s30, %s2650_s30   ;;  %s1950_s29 = sphi %s2025_s29, %s2649_s29   ;;  %s1946_s28 = sphi %s2023_s28, %s2648_s28   ;;  %s1942_s27 = sphi %s2021_s27, %s2654_s27   ;;  %s1938_s26 = sphi %s2019_s26, %s2653_s26  }
   0xa   : > { %2640 = sst [smem:[#allocation11_spill]] %s1958_s8  ;;  %s1503_s11 = sadd.s32 4294967294, %s1966_s10  }
   0xb   : > { %2641 = sst [smem:[#allocation12_spill]] %s1962_s9  ;;  %s34_s12 = sadd.s32 1, %s1958_s8 }
   0xc   : > { %p35_p0 = scmp.ge.s32.totalorder %s34_s12, 2  ;;  %s37_s13 = sadd.s32 1, %s1962_s9 }
   0xd   : > { %p197_p1 = scmp.ne.s32.totalorder %s1946_s28, %s1942_s27  ;;  %p198_p2 = scmp.eq.s32.totalorder %s1502_s5, 3 }
   0xe   : > { %s2656_s12 = smov (%p35_p0, %s34_s12), 0  ;;  %s2658_s13 = smov (!%p35_p0, %s37_s13), %s1962_s9 }
   0xf   : > { %2642 = sst [smem:[#allocation13_spill]] %s2656_s12  ;;  %s183_s14 = ssub.s32 %s1958_s8, %s2656_s12 }
  0x10   : > { %p2070_p3 = por %p198_p2, %p197_p1  ;;  %p39_p4 = scmp.ge.s32.totalorder %s2658_s13, 2 }
  0x11   : > { %p203_p5 = scmp.ne.s32.totalorder %s1942_s27, %s1938_s26  ;;  %p204_p6 = scmp.eq.s32.totalorder %s1503_s11, 3 }
  0x12   : > { %p1506_p7 = scmp.ge.s32.totalorder %s1966_s10, 1  ;;  %s2660_s13 = smov (%p39_p4, %s2658_s13), 0 }
  0x13   : > { %2644 = sst [smem:[#allocation14_spill]] %s2660_s13  ;;  %p2079_p8 = por %p204_p6, %p203_p5 }
  0x14   : > { %p283_p9 = scmp.lt.s32.totalorder %s1966_s10, 5  ;;  %s182_s17 = ssub.s32 %s1962_s9, %s2660_s13 }
  0x15   : > { %s187_s18 = sadd.s32 1, %s1946_s28  ;;  %s184_s19 = sor.u32 %s183_s14, %s182_s17 }
  0x16   : > { %p284_p10 = pnand %p1506_p7, %p283_p9  ;;  %p185_p11 = scmp.eq.s32.totalorder %s184_s19, 0 }
  0x17   : > { %s2091_s21 = sand.u32 (!%p284_p10), 1, %s1942_s27   ;;  %p330_p12 = scmp.lt.s32.totalorder (!%p284_p10), %s1954_s30, 1 }
  0x18   : > { %s2088_s20 = scalar_select %p185_p11, %s1946_s28, %s187_s18  }
  0x19   : > { %287 = sbr.rel (%p284_p10) target bundleno = 883 (0x373), region = 44  ;;  %s1507_s22 = sshll.u32 (!%p284_p10), %s2091_s21, 4 }
  0x1a   : > { %2646 = sst [smem:[#allocation15_spill]] %s2088_s20  ;;  %s1508_s23 = sshll.u32 (!%p284_p10), %s2091_s21, 8 }
  0x1b   : > { %s2112_s20 = scalar_lea.vmem (!%p284_p10), [#allocation4], %s1507_s22  ;;  %s2114_s28 = scalar_lea.vmem (!%p284_p10), [#allocation6], %s1508_s23 }
  0x1c   : > { %p1515_p13 = scmp.ne.s32.totalorder (!%p284_p10), %s1950_s29, 0 }
  0x1e   : > { %s331_s24 = scalar_select %p330_p12, %s1954_s30, 1 }
  0x1f   : > { %348 = sbr.rel (%p1515_p13) target bundleno = 240 (0xf0), region = 48 }
  0x20   : > { %s1560_s25 = sshll.u32 %s331_s24, 5  ;;  %s1561_s5 = sshll.u32 %s331_s24, 8 }
  0x21   : > { %s2100_s17 = scalar_lea.vmem %s2626_s0, %s1560_s25  ;;  %s2105_s13 = scalar_lea.vmem %s2627_s1, %s1561_s5 }
  0x22   : > { %s2110_s8 = scalar_lea.vmem %s2628_s2, %s1561_s5 }
  0x24   : > { %v354_v0 = vld [vmem:[%s2100_s17 + $0x18] sm:$0xff]  ;;  %v353_v1 = vld [vmem:[%s2100_s17 + $0x10] sm:$0xff]  ;;  %v352_v2 = vld [vmem:[%s2100_s17 + $0x8] sm:$0xff]  ;;  %vm367_vm0 = vcmask 130048   ;;  %v1968_v6 = vmov 0.0   ;;  %v1969_v8 = vmov 0  }
  0x25   : > { %402 = vmatprep.subr.mxu0 %v354_v0  ;;  %1687 = vmatprep.subr.mxu1 %v354_v0  ;;  %v351_v3 = vld [vmem:[%s2100_s17] sm:$0xff]  ;;  %v350_v5 = vld [vmem:[%s2629_s3 + $0x8] sm:$0xff] }
  0x26   : > { %403 = vmatpush1.msra.mxu0 %v353_v1  ;;  %1689 = vmatpush1.msra.mxu1 %v353_v1  ;;  %v349_v4 = vld [vmem:[%s2629_s3] sm:$0xff]  ;;  %v356_v9 = vld [vmem:[%s2630_s4 + $0x8] sm:$0xff] }
  0x27   : > { %404 = vmatprep.subr.mxu0 %v352_v2  ;;  %1688 = vmatprep.subr.mxu1 %v352_v2  ;;  %v355_v7 = vld [vmem:[%s2630_s4] sm:$0xff] }
  0x28   : > { %405 = vmatpush1.msra.mxu0 %v351_v3  ;;  %1690 = vmatpush1.msra.mxu1 %v351_v3 }
  0x29   : > { %438 = vmatprep.mubr.f32.mxu0 %v1968_v6  ;;  %444 = vmatprep.mubr.f32.mxu1 %v1968_v6 }
  0x2a   : > { %1516 = vmatmul.mubr.msk.f32.vlgmr.msra.gmra.mxu0 %vm367_vm0, %v349_v4  ;;  %1517 = vmatmul.mubr.msk.f32.vlgmr.msra.gmra.mxu1 %vm367_vm0, %v350_v5 }
  0x2b   : > { %1773 = vset.pattern.permute.xlu0 %v1969_v8 }
  0x2c   : > { %359 = vperm.xlu0 %1773, %v355_v7  }
  0x30   : > { %364 = vperm.xlu0 %1773, %v356_v9  }
  0xa7   : > { %v360_v10 = vpop.permute.xlu0 %359 }
  0xab   : > { %v365_v11 = vpop.permute.xlu0 %364 }
  0xea   : > { %v440_v12 = vpop.f32.mrf.mxu0  ;;  %v446_v13 = vpop.f32.mrf.mxu1 }
  0xeb   : > { %v441_v14 = vadd.f32 %v440_v12, %v360_v10  ;;  %v447_v15 = vadd.f32 %v446_v13, %v365_v11 }
  0xec   : > { %v442_v16 = vpop.f32.mrf.mxu0  ;;  %v448_v17 = vpop.f32.mrf.mxu1 }
  0xed   : > { %451 = vst [vmem:[#allocation2 + $0x10] sm:$0xff] %v441_v14  ;;  %453 = vst [vmem:[#allocation2 + $0x18] sm:$0xff] %v447_v15  ;;  %v443_v18 = vadd.f32 %v442_v16, %v360_v10  ;;  %v449_v19 = vadd.f32 %v448_v17, %v365_v11 }
  0xef   : > { %452 = vst [vmem:[#allocation2] sm:$0xff] %v443_v18  ;;  %454 = vst [vmem:[#allocation2 + $0x8] sm:$0xff] %v449_v19 }
  0xf0 PF: > { %s1518_s14 = sshll.u32 %s1950_s29, 7  ;;  %v462_v20 = vld [vmem:[%s2105_s13] sm:$0xff]  ;;  %vm686_vm1 = vcmask 130048   ;;  %v1970_v21 = vmov 0   ;;  %v496_v22 = vld [vmem:[%s2110_s8 + $0x10] sm:$0xff]  ;;  %v497_v26 = vld [vmem:[%s2110_s8 + $0x18] sm:$0xff] }
  0xf1   : > { %s456_s18 = sshra.s32 %s1518_s14, 7  ;;  %1639 = vmatprep.mubr.msk.f32.mxu0 %vm686_vm1, %v462_v20  ;;  %1775 = vset.pattern.permute.xlu1 %v1970_v21  ;;  %v494_v23 = vld [vmem:[%s2110_s8] sm:$0xff]  ;;  %v495_v27 = vld [vmem:[%s2110_s8 + $0x8] sm:$0xff]  ;;  %v464_v29 = vld [vmem:[%s2105_s13 + $0x10] sm:$0xff]  ;;  %s1336_s25 = scalar_lea.sflag [#allocation7], %s2091_s21 }
  0xf2   : > { %s1519_s19 = sshll.u32 %s456_s18, 3  ;;  %1774 = vset.pattern.permute.xlu0 %v1970_v21  ;;  %538 = vperm.xlu1 %1775, %v496_v22   ;;  %v463_v28 = vld [vmem:[%s2105_s13 + $0x8] sm:$0xff]  ;;  %v498_v31 = vld [vmem:[%s2110_s8 + $0x20] sm:$0xff]  ;;  %v465_v32 = vld [vmem:[%s2105_s13 + $0x18] sm:$0xff]  ;;  %s1971_s11 = smov [#allocation6]  }
  0xf3   : > { %s2139_s9 = scalar_lea.vmem %s2100_s17, %s1519_s19  ;;  %528 = vperm.xlu0 %1774, %v494_v23   ;;  %v499_v30 = vld [vmem:[%s2110_s8 + $0x28] sm:$0xff]  ;;  %v466_v33 = vld [vmem:[%s2105_s13 + $0x20] sm:$0xff]  ;;  %v501_v34 = vld [vmem:[%s2110_s8 + $0x38] sm:$0xff]  ;;  %s1367_s17 = sshll.u32 %s2114_s28, 4  ;;  %s2527_s17 = int_to_ptr.vmem [resolvable:$true] %s1367_s17 }
  0xf4   : > { %v461_v24 = vld [vmem:[%s2139_s9 + $0x10] sm:$0xff]  ;;  %v460_v25 = vld [vmem:[%s2139_s9] sm:$0xff]  ;;  %v467_v36 = vld [vmem:[%s2105_s13 + $0x28] sm:$0xff]  ;;  %s1844_s5 = scalar_lea.vmem %s2527_s17, 4096  ;;  %s1848_s14 = sshll.u32 %s1971_s11, 4  ;;  %s1849_s14 = int_to_ptr.vmem [resolvable:$false] %s1848_s14 }
  0xf5   : > { %1635 = vmatprep.subr.mxu0 %v461_v24  ;;  %v500_v35 = vld [vmem:[%s2110_s8 + $0x30] sm:$0xff]  ;;  %v503_v38 = vld [vmem:[%s2110_s8 + $0x48] sm:$0xff]  ;;  %v502_v39 = vld [vmem:[%s2110_s8 + $0x40] sm:$0xff]  ;;  %p1845_p0 = scmp.ne.s32.totalorder %s2527_s17, %s1844_s5  ;;  %p1851_p4 = scmp.lt.s32.totalorder %s2527_s17, %s1849_s14 }
  0xf6   : > { %1636 = vmatpush3.msra.mxu0 %v461_v24  ;;  %543 = vperm.xlu1 %1775, %v497_v26   ;;  %v468_v37 = vld [vmem:[%s2105_s13 + $0x30] sm:$0xff]  ;;  %v469_v40 = vld [vmem:[%s2105_s13 + $0x38] sm:$0xff]  ;;  %v470_v41 = vld [vmem:[%s2105_s13 + $0x40] sm:$0xff] }
  0xf7   : > { %1637 = vmatprep.subr.mxu0 %v460_v25  ;;  %533 = vperm.xlu0 %1774, %v495_v27   ;;  %v505_v42 = vld [vmem:[%s2110_s8 + $0x58] sm:$0xff]  ;;  %v504_v43 = vld [vmem:[%s2110_s8 + $0x50] sm:$0xff]  ;;  %v471_v44 = vld [vmem:[%s2105_s13 + $0x48] sm:$0xff]  ;;  %p1846_p1 = pnand %p1845_p0, %p2070_p3 }
  0xf8   : > { %1638 = vmatpush3.msra.mxu0 %v460_v25  ;;  %v472_v45 = vld [vmem:[%s2105_s13 + $0x50] sm:$0xff]  ;;  %v507_v46 = vld [vmem:[%s2110_s8 + $0x68] sm:$0xff]  ;;  %v506_v47 = vld [vmem:[%s2110_s8 + $0x60] sm:$0xff] }
  0xf9   : > { %1640 = vmatmul.mubr.msk.f32.vlgmr.msra.gmra.mxu0 %vm686_vm1, %v463_v28  ;;  %v473_v48 = vld [vmem:[%s2105_s13 + $0x58] sm:$0xff]  ;;  %v474_v49 = vld [vmem:[%s2105_s13 + $0x60] sm:$0xff]  ;;  %v508_v51 = vld [vmem:[%s2110_s8 + $0x70] sm:$0xff]  ;;  %p1847_p2 = pneg %p1846_p1 }
  0xfa   : > { %1642 = vmatprep.mubr.msk.f32.mxu0 %vm686_vm1, %v464_v29  ;;  %553 = vperm.xlu1 %1775, %v499_v30   ;;  %v509_v50 = vld [vmem:[%s2110_s8 + $0x78] sm:$0xff]  ;;  %v475_v52 = vld [vmem:[%s2105_s13 + $0x68] sm:$0xff]  ;;  %v476_v53 = vld [vmem:[%s2105_s13 + $0x70] sm:$0xff] }
  0xfb   : > { %548 = vperm.xlu0 %1774, %v498_v31   ;;  %v511_v54 = vld [vmem:[%s2110_s8 + $0x88] sm:$0xff]  ;;  %v510_v55 = vld [vmem:[%s2110_s8 + $0x80] sm:$0xff]  ;;  %v477_v56 = vld [vmem:[%s2105_s13 + $0x78] sm:$0xff] }
  0xfc   : > { %v478_v57 = vld [vmem:[%s2105_s13 + $0x80] sm:$0xff]  ;;  %v513_v58 = vld [vmem:[%s2110_s8 + $0x98] sm:$0xff]  ;;  %v512_v59 = vld [vmem:[%s2110_s8 + $0x90] sm:$0xff] }
  0xfd   : > { %1643 = vmatmul.mubr.msk.f32.gmra.mxu0 %vm686_vm1, %v465_v32  ;;  %v479_v60 = vld [vmem:[%s2105_s13 + $0x88] sm:$0xff]  ;;  %v480_v61 = vld [vmem:[%s2105_s13 + $0x90] sm:$0xff]  ;;  %v514_v63 = vld [vmem:[%s2110_s8 + $0xa0] sm:$0xff] }
  0xfe   : > { %1645 = vmatprep.mubr.msk.f32.mxu0 %vm686_vm1, %v466_v33  ;;  %563 = vperm.xlu1 %1775, %v501_v34   ;;  %v515_v62 = vld [vmem:[%s2110_s8 + $0xa8] sm:$0xff]  ;;  %v481_v0 = vld [vmem:[%s2105_s13 + $0x98] sm:$0xff]  ;;  %v482_v1 = vld [vmem:[%s2105_s13 + $0xa0] sm:$0xff] }
  0xff   : > { %558 = vperm.xlu0 %1774, %v500_v35   ;;  %v517_v2 = vld [vmem:[%s2110_s8 + $0xb8] sm:$0xff]  ;;  %v516_v3 = vld [vmem:[%s2110_s8 + $0xb0] sm:$0xff]  ;;  %v483_v4 = vld [vmem:[%s2105_s13 + $0xa8] sm:$0xff] }
 0x100   : > { %v484_v5 = vld [vmem:[%s2105_s13 + $0xb0] sm:$0xff]  ;;  %v519_v6 = vld [vmem:[%s2110_s8 + $0xc8] sm:$0xff]  ;;  %v518_v7 = vld [vmem:[%s2110_s8 + $0xc0] sm:$0xff] }
 0x101   : > { %1646 = vmatmul.mubr.msk.f32.gmra.mxu0 %vm686_vm1, %v467_v36  ;;  %v485_v8 = vld [vmem:[%s2105_s13 + $0xb8] sm:$0xff]  ;;  %v486_v9 = vld [vmem:[%s2105_s13 + $0xc0] sm:$0xff]  ;;  %v520_v11 = vld [vmem:[%s2110_s8 + $0xd0] sm:$0xff] }
 0x102   : > { %1648 = vmatprep.mubr.msk.f32.mxu0 %vm686_vm1, %v468_v37  ;;  %573 = vperm.xlu1 %1775, %v503_v38   ;;  %v521_v10 = vld [vmem:[%s2110_s8 + $0xd8] sm:$0xff]  ;;  %v487_v12 = vld [vmem:[%s2105_s13 + $0xc8] sm:$0xff]  ;;  %v488_v13 = vld [vmem:[%s2105_s13 + $0xd0] sm:$0xff] }
 0x103   : > { %568 = vperm.xlu0 %1774, %v502_v39   ;;  %v523_v14 = vld [vmem:[%s2110_s8 + $0xe8] sm:$0xff]  ;;  %v522_v15 = vld [vmem:[%s2110_s8 + $0xe0] sm:$0xff]  ;;  %v489_v16 = vld [vmem:[%s2105_s13 + $0xd8] sm:$0xff] }
 0x104   : > { %v490_v17 = vld [vmem:[%s2105_s13 + $0xe0] sm:$0xff]  ;;  %v525_v18 = vld [vmem:[%s2110_s8 + $0xf8] sm:$0xff]  ;;  %v524_v19 = vld [vmem:[%s2110_s8 + $0xf0] sm:$0xff]  ;;  %s1556_s8 = sshll.u32 %s1954_s30, 6 }
 0x105   : > { %1649 = vmatmul.mubr.msk.f32.gmra.mxu0 %vm686_vm1, %v469_v40  ;;  %v491_v20 = vld [vmem:[%s2105_s13 + $0xe8] sm:$0xff]  ;;  %v492_v21 = vld [vmem:[%s2105_s13 + $0xf0] sm:$0xff]  ;;  %v493_v22 = vld [vmem:[%s2105_s13 + $0xf8] sm:$0xff]  ;;  %s1364_s13 = sadd.s32 %s1950_s29, %s1556_s8 }
 0x106   : > { %1651 = vmatprep.mubr.msk.f32.mxu0 %vm686_vm1, %v470_v41  ;;  %583 = vperm.xlu1 %1775, %v505_v42   ;;  %s1557_s12 = sshll.u32 %s1364_s13, 7 }
 0x107   : > { %578 = vperm.xlu0 %1774, %v504_v43   ;;  %s2532_s24 = scalar_lea.hbm %s2633_s7, %s1557_s12 }
 0x109   : > { %1652 = vmatmul.mubr.msk.f32.gmra.mxu0 %vm686_vm1, %v471_v44 }
 0x10a   : > { %1654 = vmatprep.mubr.msk.f32.mxu0 %vm686_vm1, %v472_v45  ;;  %593 = vperm.xlu1 %1775, %v507_v46  }
 0x10b   : > { %588 = vperm.xlu0 %1774, %v506_v47  }
 0x10d   : > { %1655 = vmatmul.mubr.msk.f32.gmra.mxu0 %vm686_vm1, %v473_v48 }
 0x10e   : > { %1657 = vmatprep.mubr.msk.f32.mxu0 %vm686_vm1, %v474_v49  ;;  %603 = vperm.xlu1 %1775, %v509_v50  }
 0x10f   : > { %598 = vperm.xlu0 %1774, %v508_v51  }
 0x111   : > { %1658 = vmatmul.mubr.msk.f32.gmra.mxu0 %vm686_vm1, %v475_v52 }
 0x112   : > { %1660 = vmatprep.mubr.msk.f32.mxu0 %vm686_vm1, %v476_v53  ;;  %613 = vperm.xlu1 %1775, %v511_v54  }
 0x113   : > { %608 = vperm.xlu0 %1774, %v510_v55  }
 0x115   : > { %1661 = vmatmul.mubr.msk.f32.gmra.mxu0 %vm686_vm1, %v477_v56 }
 0x116   : > { %1663 = vmatprep.mubr.msk.f32.mxu0 %vm686_vm1, %v478_v57  ;;  %623 = vperm.xlu1 %1775, %v513_v58  }
 0x117   : > { %618 = vperm.xlu0 %1774, %v512_v59  }
 0x119   : > { %1664 = vmatmul.mubr.msk.f32.gmra.mxu0 %vm686_vm1, %v479_v60 }
 0x11a   : > { %1666 = vmatprep.mubr.msk.f32.mxu0 %vm686_vm1, %v480_v61  ;;  %633 = vperm.xlu1 %1775, %v515_v62  }
 0x11b   : > { %628 = vperm.xlu0 %1774, %v514_v63  }
 0x11d   : > { %1667 = vmatmul.mubr.msk.f32.gmra.mxu0 %vm686_vm1, %v481_v0 }
 0x11e   : > { %1669 = vmatprep.mubr.msk.f32.mxu0 %vm686_vm1, %v482_v1  ;;  %643 = vperm.xlu1 %1775, %v517_v2  }
 0x11f   : > { %638 = vperm.xlu0 %1774, %v516_v3  }
 0x121   : > { %1670 = vmatmul.mubr.msk.f32.gmra.mxu0 %vm686_vm1, %v483_v4 }
 0x122   : > { %1672 = vmatprep.mubr.msk.f32.mxu0 %vm686_vm1, %v484_v5  ;;  %653 = vperm.xlu1 %1775, %v519_v6  }
 0x123   : > { %648 = vperm.xlu0 %1774, %v518_v7  }
 0x125   : > { %1673 = vmatmul.mubr.msk.f32.gmra.mxu0 %vm686_vm1, %v485_v8 }
 0x126   : > { %1675 = vmatprep.mubr.msk.f32.mxu0 %vm686_vm1, %v486_v9  ;;  %663 = vperm.xlu1 %1775, %v521_v10  }
 0x127   : > { %658 = vperm.xlu0 %1774, %v520_v11  }
 0x129   : > { %1676 = vmatmul.mubr.msk.f32.gmra.mxu0 %vm686_vm1, %v487_v12 }
 0x12a   : > { %1678 = vmatprep.mubr.msk.f32.mxu0 %vm686_vm1, %v488_v13  ;;  %673 = vperm.xlu1 %1775, %v523_v14  }
 0x12b   : > { %668 = vperm.xlu0 %1774, %v522_v15  }
 0x12d   : > { %1679 = vmatmul.mubr.msk.f32.gmra.mxu0 %vm686_vm1, %v489_v16 }
 0x12e   : > { %1681 = vmatprep.mubr.msk.f32.mxu0 %vm686_vm1, %v490_v17  ;;  %683 = vperm.xlu1 %1775, %v525_v18  }
 0x12f   : > { %678 = vperm.xlu0 %1774, %v524_v19  }
 0x131   : > { %1682 = vmatmul.mubr.msk.f32.gmra.mxu0 %vm686_vm1, %v491_v20 }
 0x132   : > { %1684 = vmatprep.mubr.msk.f32.mxu0 %vm686_vm1, %v492_v21 }
 0x135   : > { %1685 = vmatmul.mubr.msk.f32.gmra.mxu0 %vm686_vm1, %v493_v22 }
 0x16d   : > { %v2235_v23 = vpop.permute.xlu1 %538 }
 0x16e   : > { %v529_v24 = vpop.permute.xlu0 %528 }
 0x171   : > { %v544_v25 = vpop.permute.xlu1 %543 }
 0x172   : > { %v534_v26 = vpop.permute.xlu0 %533 }
 0x175   : > { %v554_v27 = vpop.permute.xlu1 %553 }
 0x176   : > { %v549_v28 = vpop.permute.xlu0 %548 }
 0x179   : > { %v564_v29 = vpop.permute.xlu1 %563 }
 0x17a   : > { %v559_v30 = vpop.permute.xlu0 %558 }
 0x17d   : > { %v574_v31 = vpop.permute.xlu1 %573 }
 0x17e   : > { %v569_v32 = vpop.permute.xlu0 %568 }
 0x181   : > { %v584_v33 = vpop.permute.xlu1 %583 }
 0x182   : > { %v579_v35 = vpop.permute.xlu0 %578 }
 0x185   : > { %v594_v38 = vpop.permute.xlu1 %593 }
 0x186   : > { %v589_v40 = vpop.permute.xlu0 %588 }
 0x189   : > { %v604_v43 = vpop.permute.xlu1 %603 }
 0x18a   : > { %v599_v45 = vpop.permute.xlu0 %598 }
 0x18d   : > { %v614_v48 = vpop.permute.xlu1 %613 }
 0x18e   : > { %v609_v50 = vpop.permute.xlu0 %608 }
 0x191   : > { %v624_v53 = vpop.permute.xlu1 %623 }
 0x192   : > { %v619_v55 = vpop.permute.xlu0 %618 }
 0x195   : > { %v634_v58 = vpop.permute.xlu1 %633 }
 0x196   : > { %v629_v60 = vpop.permute.xlu0 %628 }
 0x199   : > { %v644_v63 = vpop.permute.xlu1 %643 }
 0x19a   : > { %v639_v1 = vpop.permute.xlu0 %638 }
 0x19d   : > { %v654_v4 = vpop.permute.xlu1 %653 }
 0x19e   : > { %v649_v6 = vpop.permute.xlu0 %648 }
 0x1a1   : > { %v664_v12 = vpop.permute.xlu1 %663 }
 0x1a2   : > { %v659_v21 = vpop.permute.xlu0 %658 }
 0x1b9   : > { %v1641_v34 = vpop.f32.mrf.mxu0 }
 0x1ba   : > { %v2243_v13 = vadd.f32 %v1641_v34, %v534_v26 }
 0x1bb   : > { %v849_v36 = vpop.f32.mrf.mxu0 }
 0x1bc   : > { %v2245_v14 = vadd.f32 %v849_v36, %v529_v24 }
 0x1bd   : > { %v1644_v37 = vpop.f32.mrf.mxu0 }
 0x1be   : > { %v2249_v17 = vadd.f32 %v1644_v37, %v544_v25 }
 0x1bf   : > { %v859_v39 = vpop.f32.mrf.mxu0 }
 0x1c0   : > { %v2258_v22 = vadd.f32 %v859_v39, %v2235_v23 }
 0x1c1   : > { %v1647_v41 = vpop.f32.mrf.mxu0 }
 0x1c2   : > { %v2237_v8 = vadd.f32 %v1647_v41, %v554_v27 }
 0x1c3   : > { %v869_v42 = vpop.f32.mrf.mxu0 }
 0x1c4   : > { %v2239_v10 = vadd.f32 %v869_v42, %v549_v28  ;;  %v1009_v26 = vmax.f32 %v2243_v13, %v2237_v8 }
 0x1c5   : > { %v1650_v44 = vpop.f32.mrf.mxu0 }
 0x1c6   : > { %v2241_v11 = vadd.f32 %v1650_v44, %v564_v29  ;;  %v1008_v25 = vmax.f32 %v2245_v14, %v2239_v10 }
 0x1c7   : > { %v879_v46 = vpop.f32.mrf.mxu0 }
 0x1c8   : > { %v2247_v15 = vadd.f32 %v879_v46, %v559_v30  ;;  %v1011_v28 = vmax.f32 %v2249_v17, %v2241_v11 }
 0x1c9   : > { %v1653_v47 = vpop.f32.mrf.mxu0 }
 0x1ca   : > { %v2251_v18 = vadd.f32 %v1653_v47, %v574_v31  ;;  %v1010_v23 = vmax.f32 %v2258_v22, %v2247_v15  ;;  %v669_v47 = vpop.permute.xlu0 %668 }
 0x1cb   : > { %v889_v49 = vpop.f32.mrf.mxu0 }
 0x1cc   : > { %v2253_v19 = vadd.f32 %v889_v49, %v569_v32  ;;  %v1013_v34 = vmax.f32 %v1009_v26, %v2251_v18 }
 0x1cd   : > { %v1656_v51 = vpop.f32.mrf.mxu0 }
 0x1ce   : > { %v2255_v20 = vadd.f32 %v1656_v51, %v584_v33 }
 0x1cf   : > { %v899_v52 = vpop.f32.mrf.mxu0 }
 0x1d0   : > { %v2262_v24 = vadd.f32 %v899_v52, %v579_v35  ;;  %v1012_v35 = vmax.f32 %v1008_v25, %v2253_v19  ;;  %v1015_v36 = vmax.f32 %v1011_v28, %v2255_v20 }
 0x1d1   : > { %v1659_v54 = vpop.f32.mrf.mxu0 }
 0x1d2   : > { %v2268_v29 = vadd.f32 %v1659_v54, %v594_v38  ;;  %v674_v38 = vpop.permute.xlu1 %673  ;;  %v1014_v39 = vmax.f32 %v1010_v23, %v2262_v24 }
 0x1d3   : > { %v909_v56 = vpop.f32.mrf.mxu0 }
 0x1d4   : > { %v2270_v30 = vadd.f32 %v909_v56, %v589_v40  ;;  %v1017_v44 = vmax.f32 %v1013_v34, %v2268_v29 }
 0x1d5   : > { %v1662_v57 = vpop.f32.mrf.mxu0 }
 0x1d6   : > { %v2274_v31 = vadd.f32 %v1662_v57, %v604_v43 }
 0x1d7   : > { %v919_v59 = vpop.f32.mrf.mxu0 }
 0x1d8   : > { %v2276_v32 = vadd.f32 %v919_v59, %v599_v45  ;;  %v1016_v45 = vmax.f32 %v1012_v35, %v2270_v30  ;;  %v1019_v49 = vmax.f32 %v1015_v36, %v2274_v31 }
 0x1d9   : > { %v1665_v61 = vpop.f32.mrf.mxu0 }
 0x1da   : > { %v2284_v40 = vadd.f32 %v1665_v61, %v614_v48 }
 0x1db   : > { %v929_v62 = vpop.f32.mrf.mxu0 }
 0x1dc   : > { %v2281_v37 = vadd.f32 %v929_v62, %v609_v50  ;;  %v1018_v50 = vmax.f32 %v1014_v39, %v2276_v32  ;;  %v1021_v56 = vmax.f32 %v1017_v44, %v2284_v40 }
 0x1dd   : > { %v1668_v0 = vpop.f32.mrf.mxu0 }
 0x1de   : > { %v2286_v41 = vadd.f32 %v1668_v0, %v624_v53  ;;  %v1020_v53 = vmax.f32 %v1016_v45, %v2281_v37 }
 0x1df   : > { %v939_v2 = vpop.f32.mrf.mxu0 }
 0x1e0   : > { %v2288_v42 = vadd.f32 %v939_v2, %v619_v55  ;;  %v1023_v57 = vmax.f32 %v1019_v49, %v2286_v41 }
 0x1e1   : > { %v1671_v3 = vpop.f32.mrf.mxu0 }
 0x1e2   : > { %v2296_v51 = vadd.f32 %v1671_v3, %v634_v58  ;;  %v1022_v59 = vmax.f32 %v1018_v50, %v2288_v42 }
 0x1e3   : > { %v949_v5 = vpop.f32.mrf.mxu0 }
 0x1e4   : > { %v2292_v46 = vadd.f32 %v949_v5, %v629_v60  ;;  %v1025_v2 = vmax.f32 %v1021_v56, %v2296_v51 }
 0x1e5   : > { %v1674_v7 = vpop.f32.mrf.mxu0 }
 0x1e6   : > { %v2298_v48 = vadd.f32 %v1674_v7, %v644_v63  ;;  %v1024_v58 = vmax.f32 %v1020_v53, %v2292_v46 }
 0x1e7   : > { %v959_v9 = vpop.f32.mrf.mxu0 }
 0x1e8   : > { %v2301_v54 = vadd.f32 %v959_v9, %v639_v1  ;;  %v684_v1 = vpop.permute.xlu1 %683  ;;  %v1027_v3 = vmax.f32 %v1023_v57, %v2298_v48 }
 0x1e9   : > { %v1677_v16 = vpop.f32.mrf.mxu0 }
 0x1ea   : > { %v2308_v60 = vadd.f32 %v1677_v16, %v654_v4 }
 0x1eb   : > { %v969_v27 = vpop.f32.mrf.mxu0 }
 0x1ec   : > { %v2303_v55 = vadd.f32 %v969_v27, %v649_v6  ;;  %v1026_v6 = vmax.f32 %v1022_v59, %v2301_v54  ;;  %v1029_v16 = vmax.f32 %v1025_v2, %v2308_v60 }
 0x1ed   : > { %v1680_v33 = vpop.f32.mrf.mxu0 }
 0x1ee   : > { %v2311_v62 = vadd.f32 %v1680_v33, %v664_v12  ;;  %v1028_v4 = vmax.f32 %v1024_v58, %v2303_v55  ;;  %v679_v12 = vpop.permute.xlu0 %678 }
 0x1ef   : > { %v979_v43 = vpop.f32.mrf.mxu0 }
 0x1f0   : > { %v2313_v63 = vadd.f32 %v979_v43, %v659_v21  ;;  %v1031_v26 = vmax.f32 %v1027_v3, %v2311_v62 }
 0x1f1   : > { %v1683_v52 = vpop.f32.mrf.mxu0 }
 0x1f2   : > { %v2321_v7 = vadd.f32 %v1683_v52, %v674_v38  ;;  %v1030_v27 = vmax.f32 %v1026_v6, %v2313_v63 }
 0x1f3   : > { %v989_v61 = vpop.f32.mrf.mxu0 }
 0x1f4   : > { %v2315_v0 = vadd.f32 %v989_v61, %v669_v47  ;;  %v1033_v23 = vmax.f32 %v1029_v16, %v2321_v7 }
 0x1f5   : > { %v1686_v5 = vpop.f32.mrf.mxu0 }
 0x1f6   : > { %v2323_v9 = vadd.f32 %v1686_v5, %v684_v1  ;;  %v1032_v25 = vmax.f32 %v1028_v4, %v2315_v0  ;;  %v1244_v5 = vld [vmem:[#allocation2] sm:$0xff] }
 0x1f7   : > { %v999_v21 = vpop.f32.mrf.mxu0  ;;  %1311 = vmatprep.mubr.f32.mxu1 %v1244_v5 }
 0x1f8   : > { %v2329_v28 = vadd.f32 %v999_v21, %v679_v12  ;;  %v1035_v33 = vmax.f32 %v1031_v26, %v2323_v9  ;;  %v1036_v35 = vmax.f32 %v1032_v25, %v1033_v23 }
 0x1fa   : > { %v1034_v34 = vmax.f32 %v1030_v27, %v2329_v28 }
 0x1fc   : > { %v1037_v36 = vmax.f32 %v1034_v34, %v1035_v33 }
 0x1fe   : > { %v1038_v38 = vmax.f32 %v1036_v35, %v1037_v36 }
 0x200   : > { %v1039_v39 = vrot.slane %v1038_v38, 4 }
 0x202   : > { %v1040_v43 = vmax.f32 %v1038_v38, %v1039_v39 }
 0x204   : > { %v1041_v44 = vrot.slane %v1040_v43, 2 }
 0x206   : > { %v1042_v45 = vmax.f32 %v1040_v43, %v1041_v44 }
 0x208   : > { %v1043_v47 = vrot.slane %v1042_v45, 1 }
 0x20a   : > { %v2334_v49 = vmax.f32 %v1042_v45, %v1043_v47 }
 0x20c   : > { %v1045_v50 = vsub.f32 %v2245_v14, %v2334_v49  ;;  %v1046_v52 = vsub.f32 %v2243_v13, %v2334_v49  ;;  %v1047_v53 = vsub.f32 %v2258_v22, %v2334_v49  ;;  %v1048_v56 = vsub.f32 %v2249_v17, %v2334_v49 }
 0x20d   : > { %v1049_v61 = vsub.f32 %v2239_v10, %v2334_v49  ;;  %v1050_v1 = vsub.f32 %v2237_v8, %v2334_v49  ;;  %v1051_v13 = vsub.f32 %v2247_v15, %v2334_v49  ;;  %v1052_v17 = vsub.f32 %v2241_v11, %v2334_v49 }
 0x20e   : > { %v1077_v57 = vmul.f32 1.442695, %v1045_v50  ;;  %v1079_v59 = vmul.f32 1.442695, %v1046_v52  ;;  %v1081_v58 = vmul.f32 1.442695, %v1047_v53  ;;  %v1053_v10 = vsub.f32 %v2253_v19, %v2334_v49 }
 0x20f   : > { %v1083_v14 = vmul.f32 1.442695, %v1048_v56  ;;  %v1085_v22 = vmul.f32 1.442695, %v1049_v61  ;;  %v1087_v2 = vmul.f32 1.442695, %v1050_v1  ;;  %v1054_v8 = vsub.f32 %v2251_v18, %v2334_v49 }
 0x210   : > { %1776 = vpow2.f32 %v1077_v57  ;;  %v1089_v3 = vmul.f32 1.442695, %v1051_v13  ;;  %v1091_v6 = vmul.f32 1.442695, %v1052_v17  ;;  %v1055_v15 = vsub.f32 %v2262_v24, %v2334_v49 }
 0x211   : > { %1778 = vpow2.f32 %v1079_v59  ;;  %v1093_v4 = vmul.f32 1.442695, %v1053_v10  ;;  %v1056_v12 = vsub.f32 %v2255_v20, %v2334_v49  ;;  %v1095_v19 = vmul.f32 1.442695, %v1054_v8 }
 0x212   : > { %1780 = vpow2.f32 %v1081_v58  ;;  %v1057_v18 = vsub.f32 %v2270_v30, %v2334_v49  ;;  %v1097_v21 = vmul.f32 1.442695, %v1055_v15  ;;  %v1058_v27 = vsub.f32 %v2268_v29, %v2334_v49 }
 0x213   : > { %1782 = vpow2.f32 %v1083_v14  ;;  %v1099_v25 = vmul.f32 1.442695, %v1056_v12  ;;  %v1059_v33 = vsub.f32 %v2276_v32, %v2334_v49  ;;  %v1060_v36 = vsub.f32 %v2274_v31, %v2334_v49 }
 0x214   : > { %1784 = vpow2.f32 %v1085_v22  ;;  %v1101_v30 = vmul.f32 1.442695, %v1057_v18  ;;  %v1103_v29 = vmul.f32 1.442695, %v1058_v27  ;;  %v1061_v43 = vsub.f32 %v2281_v37, %v2334_v49 }
 0x215   : > { %1786 = vpow2.f32 %v1087_v2  ;;  %v1105_v32 = vmul.f32 1.442695, %v1059_v33  ;;  %v1062_v47 = vsub.f32 %v2284_v40, %v2334_v49  ;;  %v1107_v31 = vmul.f32 1.442695, %v1060_v36 }
 0x216   : > { %1788 = vpow2.f32 %v1089_v3  ;;  %v1063_v53 = vsub.f32 %v2288_v42, %v2334_v49  ;;  %v1109_v37 = vmul.f32 1.442695, %v1061_v43  ;;  %v1064_v59 = vsub.f32 %v2286_v41, %v2334_v49 }
 0x217   : > { %1790 = vpow2.f32 %v1091_v6  ;;  %v1111_v40 = vmul.f32 1.442695, %v1062_v47  ;;  %v1065_v1 = vsub.f32 %v2292_v46, %v2334_v49  ;;  %v1066_v22 = vsub.f32 %v2296_v51, %v2334_v49 }
 0x218   : > { %1792 = vpow2.f32 %v1093_v4  ;;  %v1113_v42 = vmul.f32 1.442695, %v1063_v53  ;;  %v1115_v41 = vmul.f32 1.442695, %v1064_v59  ;;  %v1067_v10 = vsub.f32 %v2301_v54, %v2334_v49 }
 0x219   : > { %1794 = vpow2.f32 %v1095_v19  ;;  %v1117_v46 = vmul.f32 1.442695, %v1065_v1  ;;  %v1068_v8 = vsub.f32 %v2298_v48, %v2334_v49  ;;  %v1119_v51 = vmul.f32 1.442695, %v1066_v22 }
 0x21a   : > { %1796 = vpow2.f32 %v1097_v21  ;;  %v1069_v4 = vsub.f32 %v2303_v55, %v2334_v49  ;;  %v1121_v54 = vmul.f32 1.442695, %v1067_v10  ;;  %v1070_v18 = vsub.f32 %v2308_v60, %v2334_v49 }
 0x21b   : > { %1798 = vpow2.f32 %v1099_v25  ;;  %v1123_v48 = vmul.f32 1.442695, %v1068_v8  ;;  %v1071_v27 = vsub.f32 %v2313_v63, %v2334_v49  ;;  %v1072_v33 = vsub.f32 %v2311_v62, %v2334_v49 }
 0x21c   : > { %1800 = vpow2.f32 %v1101_v30  ;;  %v1125_v55 = vmul.f32 1.442695, %v1069_v4  ;;  %v1127_v60 = vmul.f32 1.442695, %v1070_v18  ;;  %v1073_v36 = vsub.f32 %v2315_v0, %v2334_v49 }
 0x21d   : > { %v2358_v11 = vpop.eup %1776  ;;  %1802 = vpow2.f32 %v1103_v29  ;;  %v1129_v63 = vmul.f32 1.442695, %v1071_v27  ;;  %v1074_v43 = vsub.f32 %v2321_v7, %v2334_v49  ;;  %v1131_v62 = vmul.f32 1.442695, %v1072_v33 }
 0x21e   : > { %v2362_v16 = vpop.eup %1778  ;;  %1804 = vpow2.f32 %v1105_v32  ;;  %v1075_v47 = vsub.f32 %v2329_v28, %v2334_v49  ;;  %v1133_v0 = vmul.f32 1.442695, %v1073_v36  ;;  %v1076_v53 = vsub.f32 %v2323_v9, %v2334_v49 }
 0x21f   : > { %v1141_v26 = vadd.f32 %v2362_v16, %v2358_v11  ;;  %v2368_v24 = vpop.eup %1780  ;;  %1806 = vpow2.f32 %v1107_v31  ;;  %v1135_v7 = vmul.f32 1.442695, %v1074_v43 }
 0x220   : > { %v2373_v23 = vpop.eup %1782  ;;  %1808 = vpow2.f32 %v1109_v37  ;;  %v1137_v59 = vmul.f32 1.442695, %v1075_v47 }
 0x221   : > { %v1142_v20 = vadd.f32 %v2368_v24, %v1141_v26  ;;  %v2378_v35 = vpop.eup %1784  ;;  %1810 = vpow2.f32 %v1111_v40 }
 0x222   : > { %v2383_v39 = vpop.eup %1786  ;;  %1812 = vpow2.f32 %v1113_v42 }
 0x223   : > { %v1143_v34 = vadd.f32 %v2373_v23, %v1142_v20  ;;  %v2388_v45 = vpop.eup %1788  ;;  %1814 = vpow2.f32 %v1115_v41 }
 0x224   : > { %v2393_v52 = vpop.eup %1790  ;;  %1816 = vpow2.f32 %v1117_v46 }
 0x225   : > { %v1144_v38 = vadd.f32 %v2378_v35, %v1143_v34  ;;  %v2398_v57 = vpop.eup %1792  ;;  %1818 = vpow2.f32 %v1119_v51 }
 0x226   : > { %v2403_v58 = vpop.eup %1794  ;;  %1820 = vpow2.f32 %v1121_v54 }
 0x227   : > { %v1145_v44 = vadd.f32 %v2383_v39, %v1144_v38  ;;  %v2408_v13 = vpop.eup %1796  ;;  %1822 = vpow2.f32 %v1123_v48 }
 0x228   : > { %v2413_v2 = vpop.eup %1798  ;;  %1824 = vpow2.f32 %v1125_v55 }
 0x229   : > { %v1146_v50 = vadd.f32 %v2388_v45, %v1145_v44  ;;  %v2418_v5 = vpop.eup %1800  ;;  %1826 = vpow2.f32 %v1127_v60 }
 0x22a   : > { %v2423_v15 = vpop.eup %1802  ;;  %1828 = vpow2.f32 %v1129_v63 }
 0x22b   : > { %v1147_v56 = vadd.f32 %v2393_v52, %v1146_v50  ;;  %v2428_v19 = vpop.eup %1804  ;;  %1830 = vpow2.f32 %v1131_v62 }
 0x22c   : > { %v2433_v26 = vpop.eup %1806  ;;  %1832 = vpow2.f32 %v1133_v0 }
 0x22d   : > { %v1148_v61 = vadd.f32 %v2398_v57, %v1147_v56  ;;  %v2438_v20 = vpop.eup %1808  ;;  %1834 = vpow2.f32 %v1135_v7 }
 0x22e   : > { %v2443_v34 = vpop.eup %1810  ;;  %1836 = vpow2.f32 %v1137_v59 }
 0x22f   : > { %v1149_v14 = vadd.f32 %v2403_v58, %v1148_v61  ;;  %v2448_v38 = vpop.eup %1812  ;;  %v1139_v61 = vmul.f32 1.442695, %v1076_v53 }
 0x230   : > { %v2453_v44 = vpop.eup %1814 }
 0x231   : > { %v1150_v17 = vadd.f32 %v2408_v13, %v1149_v14  ;;  %v2458_v50 = vpop.eup %1816  ;;  %1838 = vpow2.f32 %v1139_v61 }
 0x232   : > { %v2463_v56 = vpop.eup %1818 }
 0x233   : > { %v1151_v3 = vadd.f32 %v2413_v2, %v1150_v17  ;;  %v2466_v28 = vpop.eup %1820 }
 0x234   : > { %v1823_v42 = vpop.eup %1822 }
 0x235   : > { %v1152_v6 = vadd.f32 %v2418_v5, %v1151_v3  ;;  %v1825_v9 = vpop.eup %1824 }
 0x236   : > { %v1827_v22 = vpop.eup %1826 }
 0x237   : > { %v1153_v12 = vadd.f32 %v2423_v15, %v1152_v6  ;;  %v1829_v17 = vpop.eup %1828 }
 0x238   : > { %v1831_v46 = vpop.eup %1830 }
 0x239   : > { %v1154_v21 = vadd.f32 %v2428_v19, %v1153_v12  ;;  %v1833_v8 = vpop.eup %1832 }
 0x23a   : > { %v1835_v6 = vpop.eup %1834 }
 0x23b   : > { %v1155_v25 = vadd.f32 %v2433_v26, %v1154_v21  ;;  %v1837_v54 = vpop.eup %1836 }
 0x23d   : > { %v1156_v30 = vadd.f32 %v2438_v20, %v1155_v25 }
 0x23e   : > { %v1839_v18 = vpop.eup %1838 }
 0x23f   : > { %v1157_v29 = vadd.f32 %v2443_v34, %v1156_v30 }
 0x241   : > { %v1158_v32 = vadd.f32 %v2448_v38, %v1157_v29 }
 0x243   : > { %v1159_v31 = vadd.f32 %v2453_v44, %v1158_v32 }
 0x245   : > { %v1160_v37 = vadd.f32 %v2458_v50, %v1159_v31 }
 0x247   : > { %v1161_v40 = vadd.f32 %v2463_v56, %v1160_v37 }
 0x249   : > { %v1162_v1 = vadd.f32 %v2466_v28, %v1161_v40 }
 0x24b   : > { %v1163_v14 = vadd.f32 %v1823_v42, %v1162_v1 }
 0x24d   : > { %v1164_v49 = vadd.f32 %v1825_v9, %v1163_v14 }
 0x24f   : > { %v1165_v41 = vadd.f32 %v1827_v22, %v1164_v49 }
 0x251   : > { %v1166_v10 = vadd.f32 %v1829_v17, %v1165_v41 }
 0x253   : > { %v1167_v3 = vadd.f32 %v1831_v46, %v1166_v10 }
 0x255   : > { %v1168_v51 = vadd.f32 %v1833_v8, %v1167_v3 }
 0x257   : > { %v1169_v4 = vadd.f32 %v1835_v6, %v1168_v51 }
 0x259   : > { %v1170_v12 = vadd.f32 %v1837_v54, %v1169_v4 }
 0x25b   : > { %v1171_v48 = vadd.f32 %v1839_v18, %v1170_v12 }
 0x25d   : > { %v1172_v21 = vrot.slane %v1171_v48, 4 }
 0x25f   : > { %v1173_v27 = vadd.f32 %v1172_v21, %v1171_v48 }
 0x261   : > { %v1174_v55 = vrot.slane %v1173_v27, 2 }
 0x263   : > { %v1175_v25 = vadd.f32 %v1174_v55, %v1173_v27 }
 0x265   : > { %v1176_v33 = vrot.slane %v1175_v25, 1 }
 0x267   : > { %v1177_v60 = vadd.f32 %v1176_v33, %v1175_v25 }
 0x269   : > { %1840 = vrcp.f32 %v1177_v60 }
 0x276   : > { %v1841_v30 = vpop.eup %1840 }
 0x277   : > { %v1210_v36 = vmul.f32 %v1841_v30, %v1839_v18  ;;  %v1194_v63 = vmul.f32 %v1841_v30, %v2433_v26  ;;  %v1209_v29 = vmul.f32 %v1841_v30, %v1837_v54  ;;  %v1193_v43 = vmul.f32 %v1841_v30, %v2428_v19 }
 0x278   : > { %v1208_v62 = vmul.f32 %v1841_v30, %v1835_v6  ;;  %v1192_v32 = vmul.f32 %v1841_v30, %v2423_v15  ;;  %v1207_v47 = vmul.f32 %v1841_v30, %v1833_v8  ;;  %v1191_v0 = vmul.f32 %v1841_v30, %v2418_v5 }
 0x279   : > { %1242 = vst [vmem:[%s2114_s28 + $0xf8] sm:$0xff] %v1210_v36  ;;  %1597 = vmatprep.subr.mxu1 %v1210_v36  ;;  %1226 = vst [vmem:[%s2114_s28 + $0x78] sm:$0xff] %v1194_v63  ;;  %v1206_v26 = vmul.f32 %v1841_v30, %v1831_v46  ;;  %v1190_v19 = vmul.f32 %v1841_v30, %v2413_v2  ;;  %v1205_v31 = vmul.f32 %v1841_v30, %v1829_v17 }
 0x27a   : > { %1241 = vst [vmem:[%s2114_s28 + $0xf0] sm:$0xff] %v1209_v29  ;;  %1225 = vst [vmem:[%s2114_s28 + $0x70] sm:$0xff] %v1193_v43  ;;  %v1189_v53 = vmul.f32 %v1841_v30, %v2408_v13  ;;  %1598 = vmatpush3.msra.mxu1 %v1194_v63  ;;  %v1204_v5 = vmul.f32 %v1841_v30, %v1827_v22  ;;  %v1188_v15 = vmul.f32 %v1841_v30, %v2403_v58 }
 0x27b   : > { %1240 = vst [vmem:[%s2114_s28 + $0xe8] sm:$0xff] %v1208_v62  ;;  %1224 = vst [vmem:[%s2114_s28 + $0x68] sm:$0xff] %v1192_v32  ;;  %v1203_v7 = vmul.f32 %v1841_v30, %v1825_v9  ;;  %v1187_v37 = vmul.f32 %v1841_v30, %v2398_v57  ;;  %1599 = vmatprep.subr.mxu1 %v1209_v29  ;;  %v1202_v13 = vmul.f32 %v1841_v30, %v1823_v42 }
 0x27c   : > { %1239 = vst [vmem:[%s2114_s28 + $0xe0] sm:$0xff] %v1207_v47  ;;  %1223 = vst [vmem:[%s2114_s28 + $0x60] sm:$0xff] %v1191_v0  ;;  %v1186_v2 = vmul.f32 %v1841_v30, %v2393_v52  ;;  %v1201_v59 = vmul.f32 %v1841_v30, %v2466_v28  ;;  %v1185_v58 = vmul.f32 %v1841_v30, %v2388_v45  ;;  %1600 = vmatpush3.msra.mxu1 %v1193_v43 }
 0x27d   : > { %1238 = vst [vmem:[%s2114_s28 + $0xd8] sm:$0xff] %v1206_v26  ;;  %1222 = vst [vmem:[%s2114_s28 + $0x58] sm:$0xff] %v1190_v19  ;;  %v1200_v57 = vmul.f32 %v1841_v30, %v2463_v56  ;;  %v1184_v40 = vmul.f32 %v1841_v30, %v2383_v39  ;;  %v1199_v52 = vmul.f32 %v1841_v30, %v2458_v50  ;;  %1601 = vmatprep.subr.mxu1 %v1208_v62 }
 0x27e   : > { %1237 = vst [vmem:[%s2114_s28 + $0xd0] sm:$0xff] %v1205_v31  ;;  %1221 = vst [vmem:[%s2114_s28 + $0x50] sm:$0xff] %v1189_v53  ;;  %v1183_v61 = vmul.f32 %v1841_v30, %v2378_v35  ;;  %v1198_v45 = vmul.f32 %v1841_v30, %v2453_v44  ;;  %v1182_v56 = vmul.f32 %v1841_v30, %v2373_v23  ;;  %1602 = vmatpush3.msra.mxu1 %v1192_v32 }
 0x27f   : > { %1236 = vst [vmem:[%s2114_s28 + $0xc8] sm:$0xff] %v1204_v5  ;;  %1220 = vst [vmem:[%s2114_s28 + $0x48] sm:$0xff] %v1188_v15  ;;  %v1197_v39 = vmul.f32 %v1841_v30, %v2448_v38  ;;  %v1181_v28 = vmul.f32 %v1841_v30, %v2368_v24  ;;  %v1196_v35 = vmul.f32 %v1841_v30, %v2443_v34  ;;  %1603 = vmatprep.subr.mxu1 %v1207_v47  ;;  %v1245_v24 = vld [vmem:[#allocation2 + $0x18] sm:$0xff] }
 0x280   : > { %1235 = vst [vmem:[%s2114_s28 + $0xc0] sm:$0xff] %v1203_v7  ;;  %1219 = vst [vmem:[%s2114_s28 + $0x40] sm:$0xff] %v1187_v37  ;;  %v1180_v44 = vmul.f32 %v1841_v30, %v2362_v16  ;;  %v1195_v23 = vmul.f32 %v1841_v30, %v2438_v20  ;;  %v1179_v50 = vmul.f32 %v1841_v30, %v2358_v11  ;;  %1604 = vmatpush3.msra.mxu1 %v1191_v0  ;;  %v1243_v11 = vld [vmem:[#allocation2 + $0x10] sm:$0xff]  ;;  %v1246_v16 = vld [vmem:[#allocation2 + $0x8] sm:$0xff] }
 0x281   : > { %1234 = vst [vmem:[%s2114_s28 + $0xb8] sm:$0xff] %v1202_v13  ;;  %1218 = vst [vmem:[%s2114_s28 + $0x38] sm:$0xff] %v1186_v2  ;;  %1605 = vmatprep.subr.mxu1 %v1206_v26 }
 0x282   : > { %1233 = vst [vmem:[%s2114_s28 + $0xb0] sm:$0xff] %v1201_v59  ;;  %1217 = vst [vmem:[%s2114_s28 + $0x30] sm:$0xff] %v1185_v58  ;;  %1606 = vmatpush3.msra.mxu1 %v1190_v19 }
 0x283   : > { %1232 = vst [vmem:[%s2114_s28 + $0xa8] sm:$0xff] %v1200_v57  ;;  %1216 = vst [vmem:[%s2114_s28 + $0x28] sm:$0xff] %v1184_v40  ;;  %1607 = vmatprep.subr.mxu1 %v1205_v31 }
 0x284   : > { %1231 = vst [vmem:[%s2114_s28 + $0xa0] sm:$0xff] %v1199_v52  ;;  %1215 = vst [vmem:[%s2114_s28 + $0x20] sm:$0xff] %v1183_v61  ;;  %1608 = vmatpush3.msra.mxu1 %v1189_v53 }
 0x285   : > { %1230 = vst [vmem:[%s2114_s28 + $0x98] sm:$0xff] %v1198_v45  ;;  %1214 = vst [vmem:[%s2114_s28 + $0x18] sm:$0xff] %v1182_v56  ;;  %1609 = vmatprep.subr.mxu1 %v1204_v5 }
 0x286   : > { %1229 = vst [vmem:[%s2114_s28 + $0x90] sm:$0xff] %v1197_v39  ;;  %1213 = vst [vmem:[%s2114_s28 + $0x10] sm:$0xff] %v1181_v28  ;;  %1610 = vmatpush3.msra.mxu1 %v1188_v15 }
 0x287   : > { %1228 = vst [vmem:[%s2114_s28 + $0x88] sm:$0xff] %v1196_v35  ;;  %1212 = vst [vmem:[%s2114_s28 + $0x8] sm:$0xff] %v1180_v44  ;;  %1611 = vmatprep.subr.mxu1 %v1203_v7 }
 0x288   : > { %1227 = vst [vmem:[%s2114_s28 + $0x80] sm:$0xff] %v1195_v23  ;;  %1211 = vst [vmem:[%s2114_s28] sm:$0xff] %v1179_v50  ;;  %1612 = vmatpush3.msra.mxu1 %v1187_v37  ;;  %s1850_s28 = scalar_lea.vmem %s1849_s14, 8192 }
 0x289   : > { %1613 = vmatprep.subr.mxu1 %v1202_v13  ;;  %p1852_p5 = scmp.lt.s32.totalorder %s1850_s28, %s1844_s5 }
 0x28a   : > { %1614 = vmatpush3.msra.mxu1 %v1186_v2 }
 0x28b   : > { %1615 = vmatprep.subr.mxu1 %v1201_v59  ;;  %p1853_p6 = por %p1852_p5, %p1851_p4 }
 0x28c   : > { %1616 = vmatpush3.msra.mxu1 %v1185_v58 }
 0x28d   : > { %1617 = vmatprep.subr.mxu1 %v1200_v57  ;;  %p1854_p7 = pnand %p1853_p6, %p1847_p2 }
 0x28e   : > { %1618 = vmatpush3.msra.mxu1 %v1184_v40 }
 0x28f   : > { %1619 = vmatprep.subr.mxu1 %v1199_v52 }
 0x290   : > { %1620 = vmatpush3.msra.mxu1 %v1183_v61 }
 0x291   : > { %1621 = vmatprep.subr.mxu1 %v1198_v45 }
 0x292   : > { %1622 = vmatpush3.msra.mxu1 %v1182_v56 }
 0x293   : > { %1623 = vmatprep.subr.mxu1 %v1197_v39 }
 0x294   : > { %1624 = vmatpush3.msra.mxu1 %v1181_v28 }
 0x295   : > { %1625 = vmatprep.subr.mxu1 %v1196_v35 }
 0x296   : > { %1626 = vmatpush3.msra.mxu1 %v1180_v44 }
 0x297   : > { %1627 = vmatprep.subr.mxu1 %v1195_v23 }
 0x298   : > { %1628 = vmatpush3.msra.mxu1 %v1179_v50 }
 0x299   : > { %1312 = vmatmul.mubr.f32.vlgmr.msra.gmra.mxu1 %v1243_v11 }
 0x29a   : > { %1316 = vmatprep.mubr.f32.mxu1 %v1246_v16 }
 0x29d   : > { %1317 = vmatmul.mubr.f32.gmra.mxu1 %v1245_v24 }
 0x29e   : > { %1857 = shalt.err (!%p1854_p7)
}
 0x29f   : > { %s1858_s18 = scalar_lea.hbm %s2532_s24, 4096  ;;  %s1862_s13 = scalar_lea.hbm %s2633_s7, 16384 }
 0x2a0   : > { %p1859_p9 = scmp.ne.s32.totalorder %s2532_s24, %s1858_s18  ;;  %p1863_p12 = scmp.lt.s32.totalorder %s2532_s24, %s2633_s7 }
 0x2a1   : > { %p1864_p13 = scmp.lt.s32.totalorder %s1862_s13, %s1858_s18 }
 0x2a2   : > { %p1860_p10 = pnand %p1859_p9, %p2070_p3 }
 0x2a3   : > { %p1865_p0 = por %p1864_p13, %p1863_p12 }
 0x2a4   : > { %p1861_p11 = pneg %p1860_p10 }
 0x2a6   : > { %p1866_p1 = pnand %p1865_p0, %p1861_p11 }
 0x2a8   : > { %1869 = shalt.err (!%p1866_p1)
}
 0x2a9   : > { %s1972_s23 = smov 128   ;;  %s1973_s5 = smov 256   ;;  %v1842_v49 = vld [vmem:[%s2139_s9] sm:$0xff]  ;;  %v1843_v10 = vld [vmem:[%s2139_s9 + $0x10] sm:$0xff] }
 0x2aa   : > { %s1974_s11 = smov 8   ;;  %s1322_s14 = sld [smem:[#allocation3]] }
 0x2ab   : > { %1692 = dma.vmem_to_hbm [thread:$0]  (%p2070_p3), %s2527_s17, 4096, %s2532_s24, %s1336_s25, %s1972_s23, %s1973_s5, %s1974_s11  }
 0x2ac   : > { %s1554_s28 = sshll.u32 %s1954_s30, 2  ;;  %s1350_s17 = sshll.u32 %s2112_s20, 4  ;;  %s2571_s17 = int_to_ptr.vmem [resolvable:$true] %s1350_s17 }
 0x2ad   : > { %s1347_s18 = sadd.s32 %s1950_s29, %s1554_s28  ;;  %s1331_s29 = scalar_lea.sflag [#allocation5], %s2091_s21 }
 0x2ae   : > { %s1555_s19 = sshll.u32 %s1347_s18, 7  ;;  %s1870_s8 = scalar_lea.vmem %s2571_s17, 256 }
 0x2af   : > { %s2569_s30 = scalar_lea.hbm %s2632_s6, %s1555_s19  ;;  %p1871_p2 = scmp.ne.s32.totalorder %s2571_s17, %s1870_s8 }
 0x2b0   : > { %v1323_v38 = vstv %s1322_s14  ;;  %s1975_s13 = smov [#allocation4]  }
 0x2b1   : > { %p1872_p4 = pnand %p1871_p2, %p2070_p3  ;;  %s1874_s9 = sshll.u32 %s1975_s13, 4  ;;  %s1875_s9 = int_to_ptr.vmem [resolvable:$false] %s1874_s9 }
 0x2b2   : > { %s1876_s12 = scalar_lea.vmem %s1875_s9, 512  ;;  %p1877_p6 = scmp.lt.s32.totalorder %s2571_s17, %s1875_s9 }
 0x2b3   : > { %p1873_p5 = pneg %p1872_p4  ;;  %p1878_p7 = scmp.lt.s32.totalorder %s1876_s12, %s1870_s8 }
 0x2b5   : > { %p1879_p9 = por %p1878_p7, %p1877_p6 }
 0x2b7   : > { %p1880_p10 = pnand %p1879_p9, %p1873_p5 }
 0x359   : > { %v1629_v20 = vpop.f32.mrf.mxu1 }
 0x35b   : > { %v1630_v34 = vpop.f32.mrf.mxu1 }
 0x35c   : > { %v1631_v1 = vadd.f32 %v1630_v34, %v1629_v20 }
 0x35d   : > { %v1632_v42 = vpop.f32.mrf.mxu1 }
 0x35e   : > { %v1324_v14 = vmul.f32 %v1631_v1, %v1323_v38 }
 0x35f   : > { %v1633_v9 = vpop.f32.mrf.mxu1 }
 0x360   : > { %v1326_v22 = vadd.f32 %v1842_v49, %v1324_v14  ;;  %v1634_v41 = vadd.f32 %v1633_v9, %v1632_v42 }
 0x362   : > { %1328 = vst [vmem:[%s2112_s20] sm:$0xff] %v1326_v22  ;;  %v1325_v17 = vmul.f32 %v1634_v41, %v1323_v38 }
 0x364   : > { %v1327_v46 = vadd.f32 %v1843_v10, %v1325_v17 }
 0x366   : > { %1329 = vst [vmem:[%s2112_s20 + $0x8] sm:$0xff] %v1327_v46 }
 0x367   : > { %1883 = shalt.err (!%p1880_p10)
}
 0x368   : > { %s1884_s20 = scalar_lea.hbm %s2569_s30, 256  ;;  %s1888_s14 = scalar_lea.hbm %s2632_s6, 1024 }
 0x369   : > { %p1885_p11 = scmp.ne.s32.totalorder %s2569_s30, %s1884_s20  ;;  %p1889_p0 = scmp.lt.s32.totalorder %s2569_s30, %s2632_s6 }
 0x36a   : > { %p1890_p1 = scmp.lt.s32.totalorder %s1888_s14, %s1884_s20 }
 0x36b   : > { %p1886_p12 = pnand %p1885_p11, %p2070_p3 }
 0x36c   : > { %p1891_p2 = por %p1890_p1, %p1889_p0 }
 0x36d   : > { %p1887_p13 = pneg %p1886_p12 }
 0x36f   : > { %p1892_p4 = pnand %p1891_p2, %p1887_p13 }
 0x371   : > { %1895 = shalt.err (!%p1892_p4)
}
 0x372   : > { %1691 = dma.vmem_to_hbm [thread:$0]  (%p2070_p3), %s2571_s17, 256, %s2569_s30, %s1331_s29, %s1972_s23, %s1973_s5, %s1974_s11  }
 0x373 PF: > { %p1702_p5 = scmp.ge.s32.totalorder %s1966_s10, 2  ;;  %s1382_s19 = sand.u32 1, %s1938_s26  }
 0x374   : > { %s1383_s24 = scalar_lea.sflag [#allocation5], %s1382_s19 }
 0x375   : > { %p1696_p6 = pnand %p1702_p5, %p2079_p8 }
 0x377   : > { %p1697_p7 = pneg %p1696_p6 }
 0x379   : > { %1929 = dma.done.wait (%p1697_p7), %s1383_s24, 256  }
 0x37a   : > { %1931 = vsyncadd (%p1697_p7), %s1383_s24, 4294967040  ;;  %s1392_s25 = scalar_lea.sflag [#allocation7], %s1382_s19 }
 0x37b   : > { %1933 = dma.done.wait (%p1697_p7), %s1392_s25, 4096  }
 0x37c   : > { %1935 = vsyncadd (%p1697_p7), %s1392_s25, 4294963200  ;;  %s25_s10 = sadd.s32 1, %s1966_s10   ;;  %s2647_s15 = sld [smem:[#allocation10_spill]] }
 0x37d   : > { %p22_p9 = scmp.ge.s32.totalorder %s25_s10, 6   ;;  %s2648_s28 = sld [smem:[#allocation15_spill]] }
 0x37e   : > { %s2649_s29 = sld [smem:[#allocation11_spill]]  ;;  %s2653_s26 = smov %s1942_s27 }
 0x37f   : > { %s2650_s30 = sld [smem:[#allocation12_spill]]  ;;  %24 = sbr.rel (!%p22_p9) target bundleno = 9 (0x9), region = 107 }
 0x380   : > { %s2651_s8 = sld [smem:[#allocation13_spill]] }
 0x381   : > { %s2652_s9 = sld [smem:[#allocation14_spill]] }
 0x382   : > { %s2654_s27 = smov %s2647_s15 }
 0x384   :  { %1397 = vsyncpa [#allocation5], 1 }
 0x385   :  { %1399 = vsyncpa [#allocation5 + $0x1], 1 }
 0x386   :  { %1400 = vsyncpa [#allocation7], 1 }
 0x387   :  { %1402 = vsyncpa [#allocation7 + $0x1], 1 }

</bundles_post_ra>
